<compile_context>
chip_gen: v5e
topology: v5e:2x2
jax: 0.10.0
libtpu: 0.0.40
codegen_flags: <defaults>
</compile_context>

<pallas_src>
import functools
import math

import jax
import jax.numpy as jnp
from jax.experimental import pallas as pl
from jax.experimental.pallas import tpu as pltpu


def _pool_expand_kernel(x_ref, q_ref, o_ref, *, tile_b, n_in, n_out, inv_area):
    """One batch tile.

    x_ref: (tile_b*n_in, H*W)   folded batch+channel rows, native dtype
    q_ref: (H*W, Ho*Wo)         0/1 pooling operator, native dtype, VMEM-resident
    o_ref: (tile_b, n_out, Ho*Wo)
    """
    # Single folded MXU matmul, f32 accumulation, exact 1/s^2 scale on the accumulator.
    acc = jnp.dot(x_ref[...], q_ref[...], preferred_element_type=jnp.float32)
    pooled = (acc * inv_area).astype(o_ref.dtype)          # (tile_b*n_in, Ho*Wo)

    if n_out > n_in:
        # Zero-expansion channels written directly (no wrapper concat).
        o_ref[...] = jnp.zeros_like(o_ref)

    # Scatter the folded rows back into the per-batch channel slots.
    for b in range(tile_b):
        o_ref[b, :n_in, :] = pooled[b * n_in:(b + 1) * n_in, :]


def _pooling_matrix(hc, wc, ho, wo, stride, dtype):
    """0/1 average-pooling operator (hc*wc, ho*wo) for a flattened plane."""
    ij = jnp.arange(hc * wc)
    i, j = ij // wc, ij % wc
    pv = jnp.arange(ho * wo)
    p, v = pv // wo, pv % wo
    hit = (i[:, None] // stride == p[None, :]) & (j[:, None] // stride == v[None, :])
    return hit.astype(dtype)


def _choose_tile_b(n, n_in, n_out, hw, howo, itemsize,
                   target_rows=512, max_unroll=64, vmem_budget=12 * 1024 * 1024):
    """Pick batches per grid step: ~target_rows folded M rows, VMEM-bounded."""
    # Granularity that keeps the folded (tile_b*n_in, hw) block legal (multiple of 8
    # sublanes) whenever the block is not the full array.
    gran = 8 // math.gcd(n_in, 8)
    tile_b = min(n, max_unroll, max(1, target_rows // max(n_in, 1)))

    def step_bytes(tb):
        # double-buffered input + output blocks, plus double-buffered Q
        return itemsize * (2 * tb * n_in * hw + 2 * tb * n_out * howo + 2 * hw * howo)

    while tile_b > 1 and step_bytes(tile_b) > vmem_budget:
        tile_b = max(1, tile_b // 2)

    if tile_b < n:
        tile_b = max(gran, (tile_b // gran) * gran)
        tile_b = min(tile_b, n)
    return tile_b


def downsample_b(x, n_out, stride, *, force_pallas=False, pallas_min_bytes=256 * 1024):
    """Equivalent of DownsampleB(nIn, nOut, stride).forward(x) for NCHW x."""
    n, n_in, h, w = x.shape
    assert n_out % n_in == 0, "nOut must be a multiple of nIn"

    itemsize = jnp.dtype(x.dtype).itemsize
    # Tiny problems: pallas_call launch + per-step overhead dwarfs the work.
    if not force_pallas and x.size * itemsize < pallas_min_bytes:
        return _reference(x, n_out, stride)
    if stride == 1:
        # AvgPool2d(1) is the identity; only the zero-channel expansion remains.
        return _reference(x, n_out, stride)

    # nn.AvgPool2d(stride): kernel=stride, stride=stride, no padding -> floor;
    # crop trailing rows/cols exactly like PyTorch silently drops them.
    ho, wo = h // stride, w // stride
    hc, wc = ho * stride, wo * stride
    if (hc, wc) != (h, w):
        x = x[:, :, :hc, :wc]

    hw, howo = hc * wc, ho * wo
    inv_area = 1.0 / float(stride * stride)

    # 0/1 pooling operator in the input's native dtype (exact in any float dtype);
    # the 1/s^2 scale is applied to the f32 accumulator inside the kernel.
    q = _pooling_matrix(hc, wc, ho, wo, stride, x.dtype)

    tile_b = _choose_tile_b(n, n_in, n_out, hw, howo, itemsize)
    grid = (pl.cdiv(n, tile_b),)

    x_flat = x.reshape(n * n_in, hw)   # free, contiguous: fold batch+channel into M

    # Effective (memory-bound) work, not the inflated dense-matmul FLOP count.
    cost = pl.CostEstimate(
        flops=int(n * n_in * hw),
        transcendentals=0,
        bytes_accessed=int((n * n_in * hw + hw * howo + n * n_out * howo) * itemsize),
    )

    kernel = functools.partial(_pool_expand_kernel, tile_b=tile_b, n_in=n_in,
                               n_out=n_out, inv_area=inv_area)

    out = pl.pallas_call(
        kernel,
        out_shape=jax.ShapeDtypeStruct((n, n_out, howo), x.dtype),
        grid_spec=pltpu.PrefetchScalarGridSpec(
            num_scalar_prefetch=0,
            grid=grid,
            in_specs=[
                pl.BlockSpec((tile_b * n_in, hw), lambda bt: (bt, 0)),
                # Constant index_map: Q is DMA'd once and stays VMEM-resident.
                pl.BlockSpec((hw, howo), lambda bt: (0, 0)),
            ],
            out_specs=pl.BlockSpec((tile_b, n_out, howo), lambda bt: (bt, 0, 0)),
        ),
        compiler_params=pltpu.CompilerParams(
            dimension_semantics=("parallel",),
            vmem_limit_bytes=32 * 1024 * 1024,
        ),
        cost_estimate=cost,
    )(x_flat, q)

    return out.reshape(n, n_out, ho, wo)   # free reshape back to NCHW


def _reference(x, n_out, stride):
    """Pure-JAX reference matching the PyTorch forward (also the small-input path)."""
    n, n_in, h, w = x.shape
    ho, wo = h // stride, w // stride
    xc = x[:, :, :ho * stride, :wo * stride].astype(jnp.float32)
    pooled = xc.reshape(n, n_in, ho, stride, wo, stride).mean(axis=(3, 5)).astype(x.dtype)
    ratio = n_out // n_in
    if ratio <= 1:
        return pooled
    zeros = jnp.zeros((n, (ratio - 1) * n_in, ho, wo), x.dtype)
    return jnp.concatenate([pooled, zeros], axis=1)


if __name__ == "__main__":
    key = jax.random.PRNGKey(0)
    k1, k2, k3 = jax.random.split(key, 3)

    # Config 1: DownsampleB(nIn=4, nOut=8, stride=2) on x of shape (2, 4, 16, 16).
    n_in, n_out, stride = 4, 8, 2
    x = jax.random.normal(k1, (2, n_in, 16, 16), dtype=jnp.float32)
    out = jax.block_until_ready(downsample_b(x, n_out, stride, force_pallas=True))
    ref = _reference(x, n_out, stride)
    assert out.shape == (2, n_out, 8, 8), out.shape
    assert jnp.allclose(out, ref, atol=1e-5, rtol=1e-5), "mismatch vs reference (cfg 1)"

    # Config 2: larger expansion ratio and stride: DownsampleB(8, 32, 4).
    n_in2, n_out2, stride2 = 8, 32, 4
    x2 = jax.random.normal(k2, (2, n_in2, 16, 16), dtype=jnp.float32)
    out2 = jax.block_until_ready(downsample_b(x2, n_out2, stride2, force_pallas=True))
    ref2 = _reference(x2, n_out2, stride2)
    assert out2.shape == (2, n_out2, 4, 4), out2.shape
    assert jnp.allclose(out2, ref2, atol=1e-5, rtol=1e-5), "mismatch vs reference (cfg 2)"

    # Config 3: bf16 activations stay bf16 through the MXU (f32 accumulation).
    n_in3, n_out3, stride3 = 8, 16, 2
    x3 = jax.random.normal(k3, (2, n_in3, 16, 16), dtype=jnp.bfloat16)
    out3 = jax.block_until_ready(downsample_b(x3, n_out3, stride3, force_pallas=True))
    ref3 = _reference(x3, n_out3, stride3)
    assert out3.shape == (2, n_out3, 8, 8), out3.shape
    assert jnp.allclose(out3.astype(jnp.float32), ref3.astype(jnp.float32),
                        atol=2e-2, rtol=2e-2), "mismatch vs reference (cfg 3, bf16)"

    print("KERNEL_OK")
</pallas_src>

<mosaic_0001>
module attributes {stable_mosaic.version = 11 : i64} {
  func.func @_pool_expand_kernel(%arg0: i32, %arg1: memref<8x256xf32, #tpu.memory_space<vmem>>, %arg2: memref<256x64xf32, #tpu.memory_space<vmem>>, %arg3: memref<2x8x64xf32, #tpu.memory_space<vmem>>) attributes {dimension_semantics = [#tpu.dimension_semantics<parallel>], iteration_bounds = array<i64: 1>, scalar_prefetch = 0 : i64, scratch_operands = 0 : i64, tpu.core_type = #tpu.core_type<tc>, window_params = [{transform_indices = @transform_0, window_bounds = array<i64: 8, 256>}, {pipeline_mode = #tpu.pipeline_mode<synchronous>, transform_indices = @transform_1, window_bounds = array<i64: 256, 64>}, {transform_indices = @transform_2, window_bounds = array<i64: 2, 8, 64>}]} {
    %c0 = arith.constant 0 : index
    %c0_0 = arith.constant 0 : index
    %0 = vector.load %arg1[%c0, %c0_0] : memref<8x256xf32, #tpu.memory_space<vmem>>, vector<8x256xf32>
    %c0_1 = arith.constant 0 : index
    %c0_2 = arith.constant 0 : index
    %1 = vector.load %arg2[%c0_1, %c0_2] : memref<256x64xf32, #tpu.memory_space<vmem>>, vector<256x64xf32>
    %cst = arith.constant dense<0.000000e+00> : vector<8x64xf32>
    %2 = tpu.matmul %0, %1, %cst {dimension_numbers = #tpu.dot_dimension_numbers<[1], [0], [0], [1], [0, 0, 1, 1], [], []>} : vector<8x256xf32>, vector<256x64xf32>, vector<8x64xf32> -> vector<8x64xf32>
    %cst_3 = arith.constant 2.500000e-01 : f32
    %3 = vector.broadcast %cst_3 : f32 to vector<8x64xf32>
    %4 = arith.mulf %2, %3 : vector<8x64xf32>
    %cst_4 = arith.constant 0.000000e+00 : f32
    %5 = vector.broadcast %cst_4 : f32 to vector<2x8x64xf32>
    %c0_5 = arith.constant 0 : index
    %c0_6 = arith.constant 0 : index
    %c0_7 = arith.constant 0 : index
    %6 = vector.load %arg3[%c0_5, %c0_6, %c0_7] : memref<2x8x64xf32, #tpu.memory_space<vmem>>, vector<2x8x64xf32>
    tpu.vector_store %arg3[%c0_5, %c0_6, %c0_7], %5 {strides = array<i32>} : memref<2x8x64xf32, #tpu.memory_space<vmem>>, vector<2x8x64xf32>,
    %7 = vector.extract_strided_slice %4 {offsets = [0, 0], sizes = [4, 64], strides = [1, 1]} : vector<8x64xf32> to vector<4x64xf32>
    %c0_8 = arith.constant 0 : index
    %c0_9 = arith.constant 0 : index
    %c0_10 = arith.constant 0 : index
    %8 = vector.load %arg3[%c0_8, %c0_9, %c0_10] : memref<2x8x64xf32, #tpu.memory_space<vmem>>, vector<1x4x64xf32>
    %9 = vector.shape_cast %8 : vector<1x4x64xf32> to vector<4x64xf32>
    %10 = vector.shape_cast %7 : vector<4x64xf32> to vector<1x4x64xf32>
    tpu.vector_store %arg3[%c0_8, %c0_9, %c0_10], %10 {strides = array<i32>} : memref<2x8x64xf32, #tpu.memory_space<vmem>>, vector<1x4x64xf32>,
    %11 = vector.extract_strided_slice %4 {offsets = [4, 0], sizes = [4, 64], strides = [1, 1]} : vector<8x64xf32> to vector<4x64xf32>
    %c1 = arith.constant 1 : index
    %c0_11 = arith.constant 0 : index
    %c0_12 = arith.constant 0 : index
    %12 = vector.load %arg3[%c1, %c0_11, %c0_12] : memref<2x8x64xf32, #tpu.memory_space<vmem>>, vector<1x4x64xf32>
    %13 = vector.shape_cast %12 : vector<1x4x64xf32> to vector<4x64xf32>
    %14 = vector.shape_cast %11 : vector<4x64xf32> to vector<1x4x64xf32>
    tpu.vector_store %arg3[%c1, %c0_11, %c0_12], %14 {strides = array<i32>} : memref<2x8x64xf32, #tpu.memory_space<vmem>>, vector<1x4x64xf32>,
    return
  }
  func.func @transform_0(%arg0: i32) -> (i32, i32) {
    %c0_i32 = arith.constant 0 : i32
    %c0_i32_0 = arith.constant 0 : i32
    return %arg0, %c0_i32 : i32, i32
  }
  func.func @transform_1(%arg0: i32) -> (i32, i32) {
    %c0_i32 = arith.constant 0 : i32
    %c0_i32_0 = arith.constant 0 : i32
    %c0_i32_1 = arith.constant 0 : i32
    return %c0_i32, %c0_i32_0 : i32, i32
  }
  func.func @transform_2(%arg0: i32) -> (i32, i32, i32) {
    %c0_i32 = arith.constant 0 : i32
    %c0_i32_0 = arith.constant 0 : i32
    %c0_i32_1 = arith.constant 0 : i32
    return %arg0, %c0_i32, %c0_i32_0 : i32, i32, i32
  }
}

</mosaic_0001>

<bundles_post_ra>
// kernel: tpu_custom_call.1
= control target key start
LH: loop header
LB: loop body
LE: loop exit
PB: predicated region body
PF: predicated region fallthrough
CT: control target
= control target key end

     0   :  { %s267_s0 = inlined_call_operand.vmem [shape: f32[8,256], index: 0, kind: input, shape index: {}]   ;;  %s268_s1 = inlined_call_operand.vmem [shape: f32[256,64], index: 1, kind: input, shape index: {}]   ;;  %s269_s2 = inlined_call_operand.hbm [shape: f32[2,8,64], index: 2, kind: output, shape index: {}]  }
   0x1   :  { %v29_v0 = vld [vmem:[%s268_s1 + $0x78] sm:$0xff]  ;;  %v28_v2 = vld [vmem:[%s268_s1 + $0x70] sm:$0xff]  ;;  %v27_v4 = vld [vmem:[%s268_s1 + $0x68] sm:$0xff] }
   0x2   :  { %v45_v1 = vld [vmem:[%s268_s1 + $0xf8] sm:$0xff]  ;;  %46 = vmatpush.msra.mxu0 %v29_v0  ;;  %v44_v3 = vld [vmem:[%s268_s1 + $0xf0] sm:$0xff]  ;;  %v43_v5 = vld [vmem:[%s268_s1 + $0xe8] sm:$0xff] }
   0x3   :  { %66 = vmatpush.msra.mxu1 %v45_v1  ;;  %v26_v6 = vld [vmem:[%s268_s1 + $0x60] sm:$0xff]  ;;  %v25_v8 = vld [vmem:[%s268_s1 + $0x58] sm:$0xff]  ;;  %v24_v10 = vld [vmem:[%s268_s1 + $0x50] sm:$0xff] }
   0x4   :  { %47 = vmatpush.msra.mxu0 %v28_v2  ;;  %v42_v7 = vld [vmem:[%s268_s1 + $0xe0] sm:$0xff]  ;;  %v41_v9 = vld [vmem:[%s268_s1 + $0xd8] sm:$0xff]  ;;  %v40_v11 = vld [vmem:[%s268_s1 + $0xd0] sm:$0xff] }
   0x5   :  { %67 = vmatpush.msra.mxu1 %v44_v3  ;;  %v23_v12 = vld [vmem:[%s268_s1 + $0x48] sm:$0xff] }
   0x6   :  { %48 = vmatpush.msra.mxu0 %v27_v4  ;;  %v39_v13 = vld [vmem:[%s268_s1 + $0xc8] sm:$0xff] }
   0x7   :  { %68 = vmatpush.msra.mxu1 %v43_v5 }
   0x8   :  { %49 = vmatpush.msra.mxu0 %v26_v6 }
   0x9   :  { %69 = vmatpush.msra.mxu1 %v42_v7 }
   0xa   :  { %50 = vmatpush.msra.mxu0 %v25_v8 }
   0xb   :  { %70 = vmatpush.msra.mxu1 %v41_v9 }
   0xc   :  { %51 = vmatpush.msra.mxu0 %v24_v10 }
   0xd   :  { %71 = vmatpush.msra.mxu1 %v40_v11 }
   0xe   :  { %7 = vsyncpa [#allocation3], 0  ;;  %v22_v14 = vld [vmem:[%s268_s1 + $0x40] sm:$0xff]  ;;  %52 = vmatpush.msra.mxu0 %v23_v12  ;;  %v21_v16 = vld [vmem:[%s268_s1 + $0x38] sm:$0xff]  ;;  %vm87_vm0 = vcmask 523264   ;;  %v143_v34 = vmov 0.0  }
   0xf   :  { %v38_v15 = vld [vmem:[%s268_s1 + $0xc0] sm:$0xff]  ;;  %72 = vmatpush.msra.mxu1 %v39_v13  ;;  %v37_v17 = vld [vmem:[%s268_s1 + $0xb8] sm:$0xff]  ;;  %v20_v18 = vld [vmem:[%s268_s1 + $0x30] sm:$0xff]  ;;  %88 = vst.msk [vmem:[#allocation2] sm:$0xff] %vm87_vm0, %v143_v34  ;;  %s101_s24 = sshll.u32 %s269_s2, 4  ;;  %vm90_vm1 = vcmask 519168   ;;  %s102_s24 = int_to_ptr.hbm [resolvable:$true] %s101_s24 }
  0x10   :  { %53 = vmatpush.msra.mxu0 %v22_v14  ;;  %v36_v19 = vld [vmem:[%s268_s1 + $0xb0] sm:$0xff]  ;;  %v19_v20 = vld [vmem:[%s268_s1 + $0x28] sm:$0xff]  ;;  %v18_v22 = vld [vmem:[%s268_s1 + $0x20] sm:$0xff]  ;;  %89 = vst.msk [vmem:[#allocation2 + $0x8] sm:$0xff] %vm87_vm0, %v143_v34  ;;  %vm93_vm2 = vcmask 523268   ;;  %s146_s25 = smov 8  }
  0x11   :  { %73 = vmatpush.msra.mxu1 %v38_v15  ;;  %v35_v21 = vld [vmem:[%s268_s1 + $0xa8] sm:$0xff]  ;;  %v34_v23 = vld [vmem:[%s268_s1 + $0xa0] sm:$0xff]  ;;  %v17_v24 = vld [vmem:[%s268_s1 + $0x18] sm:$0xff] }
  0x12   :  { %54 = vmatpush.msra.mxu0 %v21_v16  ;;  %v33_v25 = vld [vmem:[%s268_s1 + $0x98] sm:$0xff]  ;;  %v16_v26 = vld [vmem:[%s268_s1 + $0x10] sm:$0xff]  ;;  %v15_v28 = vld [vmem:[%s268_s1 + $0x8] sm:$0xff] }
  0x13   :  { %74 = vmatpush.msra.mxu1 %v37_v17  ;;  %v32_v27 = vld [vmem:[%s268_s1 + $0x90] sm:$0xff]  ;;  %v31_v29 = vld [vmem:[%s268_s1 + $0x88] sm:$0xff]  ;;  %v14_v30 = vld [vmem:[%s268_s1] sm:$0xff] }
  0x14   :  { %55 = vmatpush.msra.mxu0 %v20_v18  ;;  %v30_v31 = vld [vmem:[%s268_s1 + $0x80] sm:$0xff]  ;;  %v13_v33 = vld [vmem:[%s267_s0 + $0x8] sm:$0xff]  ;;  %s144_s1 = smov [#allocation2]  }
  0x15   :  { %75 = vmatpush.msra.mxu1 %v36_v19  ;;  %v12_v32 = vld [vmem:[%s267_s0] sm:$0xff]  ;;  %s99_s21 = sshll.u32 %s144_s1, 4  ;;  %s145_s0 = smov 128   ;;  %s100_s21 = int_to_ptr.vmem [resolvable:$true] %s99_s21 }
  0x16   :  { %56 = vmatpush.msra.mxu0 %v19_v20 }
  0x17   :  { %76 = vmatpush.msra.mxu1 %v35_v21 }
  0x18   :  { %57 = vmatpush.msra.mxu0 %v18_v22 }
  0x19   :  { %77 = vmatpush.msra.mxu1 %v34_v23 }
  0x1a   :  { %58 = vmatpush.msra.mxu0 %v17_v24 }
  0x1b   :  { %78 = vmatpush.msra.mxu1 %v33_v25 }
  0x1c   :  { %59 = vmatpush.msra.mxu0 %v16_v26 }
  0x1d   :  { %79 = vmatpush.msra.mxu1 %v32_v27 }
  0x1e   :  { %60 = vmatpush.msra.mxu0 %v15_v28 }
  0x1f   :  { %80 = vmatpush.msra.mxu1 %v31_v29 }
  0x20   :  { %61 = vmatpush.msra.mxu0 %v14_v30 }
  0x21   :  { %81 = vmatpush.msra.mxu1 %v30_v31  ;;  %62 = vmatmul.f32.vlgmr.msra.gmra.mxu0 %v12_v32 }
  0x22   :  { %82 = vmatmul.f32.vlgmr.msra.gmra.mxu1 %v13_v33 }
  0x9e   :  { %v63_v35 = vpop.f32.mrf.mxu0 }
  0x9f   :  { %v83_v36 = vpop.f32.mrf.mxu1 }
  0xa0   :  { %v84_v37 = vadd.f32 %v83_v36, %v63_v35 }
  0xa2   :  { %v86_v38 = vmul.f32 0.25, %v84_v37 }
  0xa4   :  { %91 = vst.msk [vmem:[#allocation2] sm:$0xf] %vm90_vm1, %v86_v38 }
  0xa5   :  { %94 = vst.msk [vmem:[#allocation2 + $0x4] sm:$0xf0] %vm93_vm2, %v86_v38 }
  0xa6   :  { %107 = dma.vmem_to_hbm [thread:$0]  %s100_s21, 256, %s102_s24, [#allocation3], %s145_s0, %s145_s0, %s146_s25  }
  0xa7   :  { %141 = dma.done.wait [#allocation3], 256  }
  0xa8   :  { %142 = vsyncadd [#allocation3], 4294967040 }
  0xa9   :  { %112 = vsyncpa [#allocation3], 1 }

</bundles_post_ra>
